<compile_context>
chip_gen: v5e
topology: v5e:2x2
jax: 0.10.0
libtpu: 0.0.40
codegen_flags: <defaults>
</compile_context>

<pallas_src>
import functools
import math

import jax
import jax.numpy as jnp
import numpy as np
from jax.experimental import pallas as pl
from jax.experimental.pallas import tpu as pltpu

# In-kernel one-hot gather only while the one-hot intermediate stays narrow
# (<= 2 vreg columns) AND node ids stay exactly representable in bf16.
_MAX_ONEHOT_LANES = 256


def _diachronic_onehot_kernel(rep_ref, node_ref, wb_ref, mask_ref, nt_ref,
                              x_ref, o_ref, *, lane_w, use_sin):
    """Row tile; node-parameter gather done in-kernel (small num_nodes).

    Resident (constant index_map, stay in VMEM across the grid):
      rep_ref  : (2*pack, lane_w + pack*nn)  blockdiag(rep_t, rep_n) lane-repeat
      node_ref : (1, pack*nn)                tiled node-id row (hoisted iota)
      wb_ref   : (pack*nn, 2*lane_w)         block-diagonal [w | b] gather table
      mask_ref : (1, lane_w)                 1.0 on time-modulated lanes
    Per tile:
      nt_ref   : (bm, 2*pack)                packed [t | nid]  (single DMA)
      x_ref    : (bm, lane_w)                lane-packed embeddings
    """
    f32 = jnp.float32
    # One fused MXU matmul lane-repeats both t and nid.
    rep = jnp.dot(nt_ref[...], rep_ref[...], preferred_element_type=f32)
    t_rep = rep[:, :lane_w]                       # (bm, lane_w), aligned slice
    nid_rep = rep[:, lane_w:]                     # (bm, pack*nn)
    # One-hot over node ids (tolerant compare; ids are exact small integers).
    onehot = (jnp.abs(nid_rep - node_ref[...]) < 0.5).astype(f32)
    # One fused MXU matmul gathers w[nid] and b[nid]; no HBM wn/bn slabs.
    wb = jnp.dot(onehot, wb_ref[...], preferred_element_type=f32)
    wn = wb[:, :lane_w]
    bn = wb[:, lane_w:]

    x_f = x_ref[...].astype(f32)
    phase = wn * t_rep + bn                       # zero on pass-through lanes
    te = jnp.sin(phase) if use_sin else jnp.cos(phase)
    # Select (not mask arithmetic): pass-through lanes reproduce x bit-exactly.
    mask_f = jnp.broadcast_to(mask_ref[...], x_f.shape)
    o_ref[...] = jnp.where(mask_f > 0.5, te * x_f, x_f).astype(o_ref.dtype)


def _diachronic_phase_kernel(place_ref, mask_ref, ph_ref, x_ref, o_ref, *,
                             use_sin):
    """Row tile for the large-num_nodes fallback.

    The wrapper already gathered w[nid], b[nid] and formed the compact phase
    w[nid]*t + b[nid]  ->  ph_ref: (bm, pack*t_dim).  The kernel evaluates
    sin/cos on the compact slab only, scatters it onto the interleaved lane
    layout with an exact one-hot placement matmul, and modulates x.
      place_ref : (pack*t_dim, lane_w)  resident one-hot placement matrix
      mask_ref  : (1, lane_w)           resident time-lane mask
    """
    f32 = jnp.float32
    ph = ph_ref[...].astype(f32)
    te_c = jnp.sin(ph) if use_sin else jnp.cos(ph)
    te = jnp.dot(te_c, place_ref[...], preferred_element_type=f32)  # (bm, lane_w)
    x_f = x_ref[...].astype(f32)
    mask_f = jnp.broadcast_to(mask_ref[...], x_f.shape)
    o_ref[...] = jnp.where(mask_f > 0.5, te * x_f, x_f).astype(o_ref.dtype)


def _pick_pack(h_dim, max_lane=2048):
    """Smallest pack making lane_w = pack*h_dim a multiple of 128."""
    pack = 128 // math.gcd(h_dim, 128)
    if pack * h_dim > max_lane:
        return 1    # correct but falls back to masked partial stores
    return pack


def _pick_bm(n_packed, lane_w, itemsize, block_rows):
    """Row-tile size: ~2 MiB of x per grid step, multiple of 512 when large,
    and at least 2 grid steps so v7x's two TensorCores can both be used."""
    if block_rows is None:
        rows = (2 * 1024 * 1024) // max(1, lane_w * itemsize)
        block_rows = max(512, min(4096, (rows // 512) * 512))
    if n_packed <= 8:
        return n_packed                      # single full-array block
    cap = ((-(-n_packed // 2) + 7) // 8) * 8   # ceil(n/2) rounded up to 8
    return max(8, min(block_rows, cap))


def diachronic_forward(w, b, nid, x, t, *, activ="sin", block_rows=None):
    """JAX/Pallas equivalent of Diachronic.forward.

    w, b : [num_nodes, t_dim]   learned parameters
    nid  : [...]                integer node ids (same leading shape as x[..., 0])
    x    : [N, H] or [B, L, H]  node embeddings
    t    : [N, 1] or [B, L, 1]  timestamps
    """
    f32 = jnp.float32
    num_nodes, t_dim = w.shape
    h_dim = x.shape[-1]
    lead_shape = x.shape[:-1]
    assert 0 <= t_dim <= h_dim

    if t_dim == 0:          # gamma == 0: embeddings are time-invariant
        return x

    pack = _pick_pack(h_dim)
    lane_w = pack * h_dim

    nid_flat = nid.reshape(-1)
    x_flat = x.reshape(-1, h_dim)
    t_flat = t.reshape(-1).astype(f32)
    n_rows = x_flat.shape[0]

    # Pad rows only to a multiple of `pack` so the lane-dense fold is a free
    # row-major reshape; raggedness vs the row tile is handled by the cdiv
    # grid (Pallas bounds the partial last block).
    n_pad = (-n_rows) % pack
    if n_pad:
        x_flat = jnp.pad(x_flat, ((0, n_pad), (0, 0)))
        t_flat = jnp.pad(t_flat, ((0, n_pad),))
        nid_flat = jnp.pad(nid_flat, ((0, n_pad),))
    n_packed = (n_rows + n_pad) // pack

    x_p = x_flat.reshape(n_packed, lane_w)          # free fold, no data shuffle
    t_p = t_flat.reshape(n_packed, pack)
    mask = ((jnp.arange(lane_w) % h_dim) < t_dim).astype(f32).reshape(1, lane_w)

    bm = _pick_bm(n_packed, lane_w, x.dtype.itemsize, block_rows)
    grid = (pl.cdiv(n_packed, bm),)
    use_sin = (activ == "sin")

    common = dict(
        out_shape=jax.ShapeDtypeStruct((n_packed, lane_w), x.dtype),
        compiler_params=pltpu.CompilerParams(
            dimension_semantics=("parallel",),
            vmem_limit_bytes=48 * 1024 * 1024,
        ),
    )

    if pack * num_nodes <= _MAX_ONEHOT_LANES:
        # --- small node table: gather in-kernel; HBM traffic ~= x in + out ---
        nid_p = nid_flat.reshape(n_packed, pack).astype(f32)
        nt_p = jnp.concatenate([t_p, nid_p], axis=-1)        # (n_packed, 2*pack)

        eye_p = jnp.eye(pack, dtype=f32)
        rep_t = jnp.kron(eye_p, jnp.ones((1, h_dim), f32))        # (pack, lane_w)
        rep_n = jnp.kron(eye_p, jnp.ones((1, num_nodes), f32))    # (pack, pack*nn)
        rep_blk = jnp.concatenate(
            [jnp.concatenate([rep_t, jnp.zeros((pack, pack * num_nodes), f32)], -1),
             jnp.concatenate([jnp.zeros((pack, lane_w), f32), rep_n], -1)],
            axis=0)                                       # (2*pack, lane_w+pack*nn)
        node_row = jnp.tile(jnp.arange(num_nodes, dtype=f32),
                            pack).reshape(1, pack * num_nodes)
        w_pad = jnp.pad(w.astype(f32), ((0, 0), (0, h_dim - t_dim)))
        b_pad = jnp.pad(b.astype(f32), ((0, 0), (0, h_dim - t_dim)))
        wb_tab = jnp.concatenate(
            [jnp.kron(eye_p, w_pad), jnp.kron(eye_p, b_pad)], axis=-1)

        kernel = functools.partial(_diachronic_onehot_kernel,
                                   lane_w=lane_w, use_sin=use_sin)
        out_p = pl.pallas_call(
            kernel,
            grid_spec=pltpu.PrefetchScalarGridSpec(
                num_scalar_prefetch=0,
                grid=grid,
                in_specs=[
                    pl.BlockSpec(rep_blk.shape, lambda i: (0, 0)),    # resident
                    pl.BlockSpec(node_row.shape, lambda i: (0, 0)),   # resident
                    pl.BlockSpec(wb_tab.shape, lambda i: (0, 0)),     # resident
                    pl.BlockSpec(mask.shape, lambda i: (0, 0)),       # resident
                    pl.BlockSpec((bm, 2 * pack), lambda i: (i, 0)),   # [t | nid]
                    pl.BlockSpec((bm, lane_w), lambda i: (i, 0)),     # x
                ],
                out_specs=pl.BlockSpec((bm, lane_w), lambda i: (i, 0)),
            ),
            **common,
        )(rep_blk, node_row, wb_tab, mask, nt_p, x_p)
    else:
        # --- large node table: gather (and the affine) in the wrapper; the
        # kernel keeps the transcendental + modulate + concat. ---------------
        wn = jnp.take(w, nid_flat, axis=0).astype(f32)     # exact integer gather
        bn = jnp.take(b, nid_flat, axis=0).astype(f32)
        phase = (wn * t_flat[:, None] + bn).reshape(n_packed, pack * t_dim)

        rows_i = np.arange(pack * t_dim)
        cols_i = (rows_i // t_dim) * h_dim + (rows_i % t_dim)
        place_np = np.zeros((pack * t_dim, lane_w), np.float32)
        place_np[rows_i, cols_i] = 1.0
        place = jnp.asarray(place_np)

        kernel = functools.partial(_diachronic_phase_kernel, use_sin=use_sin)
        out_p = pl.pallas_call(
            kernel,
            grid_spec=pltpu.PrefetchScalarGridSpec(
                num_scalar_prefetch=0,
                grid=grid,
                in_specs=[
                    pl.BlockSpec(place.shape, lambda i: (0, 0)),          # resident
                    pl.BlockSpec(mask.shape, lambda i: (0, 0)),           # resident
                    pl.BlockSpec((bm, pack * t_dim), lambda i: (i, 0)),   # phase
                    pl.BlockSpec((bm, lane_w), lambda i: (i, 0)),         # x
                ],
                out_specs=pl.BlockSpec((bm, lane_w), lambda i: (i, 0)),
            ),
            **common,
        )(place, mask, phase, x_p)

    out = out_p.reshape(n_packed * pack, h_dim)
    if n_pad:
        out = out[:n_rows]
    return out.reshape(*lead_shape, h_dim)


def diachronic_reference(w, b, nid, x, t, *, activ="sin"):
    """Pure-JAX reference mirroring the PyTorch forward exactly."""
    t_dim = w.shape[-1]
    f = jnp.sin if activ == "sin" else jnp.cos
    time_embed = f(w[nid] * t + b[nid])
    return jnp.concatenate(
        (time_embed * x[..., :t_dim], x[..., t_dim:]), axis=-1)


if __name__ == "__main__":
    key = jax.random.PRNGKey(0)

    # Module config: num_nodes=10, h_dim=32, gamma=0.5 -> t_dim=16
    num_nodes, h_dim, gamma = 10, 32, 0.5
    t_dim = int(h_dim * gamma)

    keys = jax.random.split(key, 20)
    w = jax.random.normal(keys[0], (num_nodes, t_dim), dtype=jnp.float32)
    b = jax.random.normal(keys[1], (num_nodes, t_dim), dtype=jnp.float32)

    # Case 1: [N, H] inputs, sin
    N = 8
    nid = jax.random.randint(keys[2], (N,), 0, num_nodes)
    x = jax.random.normal(keys[3], (N, h_dim), dtype=jnp.float32)
    ts = jax.random.uniform(keys[4], (N, 1), dtype=jnp.float32) * 10.0
    out = jax.block_until_ready(diachronic_forward(w, b, nid, x, ts, activ="sin"))
    ref = diachronic_reference(w, b, nid, x, ts, activ="sin")
    assert out.shape == ref.shape == (N, h_dim)
    assert jnp.allclose(out, ref, atol=1e-5, rtol=1e-5), "2D sin mismatch"
    assert jnp.array_equal(out[:, t_dim:], x[:, t_dim:]), "pass-through not exact"

    # Case 2: [B, L, H] inputs, sin
    B, L = 2, 8
    nid3 = jax.random.randint(keys[5], (B, L), 0, num_nodes)
    x3 = jax.random.normal(keys[6], (B, L, h_dim), dtype=jnp.float32)
    ts3 = jax.random.uniform(keys[7], (B, L, 1), dtype=jnp.float32) * 10.0
    out3 = jax.block_until_ready(diachronic_forward(w, b, nid3, x3, ts3, activ="sin"))
    ref3 = diachronic_reference(w, b, nid3, x3, ts3, activ="sin")
    assert out3.shape == ref3.shape == (B, L, h_dim)
    assert jnp.allclose(out3, ref3, atol=1e-5, rtol=1e-5), "3D sin mismatch"

    # Case 3: row count not a multiple of the lane-pack factor, cos activation
    N2 = 7
    nid2 = jax.random.randint(keys[8], (N2,), 0, num_nodes)
    x2 = jax.random.normal(keys[9], (N2, h_dim), dtype=jnp.float32)
    ts2 = jax.random.uniform(keys[10], (N2, 1), dtype=jnp.float32) * 10.0
    out2 = jax.block_until_ready(diachronic_forward(w, b, nid2, x2, ts2, activ="cos"))
    ref2 = diachronic_reference(w, b, nid2, x2, ts2, activ="cos")
    assert jnp.allclose(out2, ref2, atol=1e-5, rtol=1e-5), "cos / ragged mismatch"

    # Case 4: multi-step grid with a partial last row tile (2-TC split path)
    N4 = 2500
    nid4 = jax.random.randint(keys[11], (N4,), 0, num_nodes)
    x4 = jax.random.normal(keys[12], (N4, h_dim), dtype=jnp.float32)
    ts4 = jax.random.uniform(keys[13], (N4, 1), dtype=jnp.float32) * 10.0
    out4 = jax.block_until_ready(diachronic_forward(w, b, nid4, x4, ts4, activ="sin"))
    ref4 = diachronic_reference(w, b, nid4, x4, ts4, activ="sin")
    assert jnp.allclose(out4, ref4, atol=1e-5, rtol=1e-5), "multi-block mismatch"

    # Case 5: large num_nodes -> wrapper-side gather fallback path
    num_nodes5 = 300
    w5 = jax.random.normal(keys[14], (num_nodes5, t_dim), dtype=jnp.float32)
    b5 = jax.random.normal(keys[15], (num_nodes5, t_dim), dtype=jnp.float32)
    N5 = 64
    nid5 = jax.random.randint(keys[16], (N5,), 0, num_nodes5)
    x5 = jax.random.normal(keys[17], (N5, h_dim), dtype=jnp.float32)
    ts5 = jax.random.uniform(keys[18], (N5, 1), dtype=jnp.float32) * 10.0
    out5 = jax.block_until_ready(diachronic_forward(w5, b5, nid5, x5, ts5, activ="sin"))
    ref5 = diachronic_reference(w5, b5, nid5, x5, ts5, activ="sin")
    assert jnp.allclose(out5, ref5, atol=1e-5, rtol=1e-5), "fallback path mismatch"
    assert jnp.array_equal(out5[:, t_dim:], x5[:, t_dim:]), "fallback pass-through"

    print("KERNEL_OK")
</pallas_src>

<mosaic_0001>
module attributes {stable_mosaic.version = 11 : i64} {
  func.func @_diachronic_onehot_kernel(%arg0: i32, %arg1: memref<8x168xf32, #tpu.memory_space<vmem>>, %arg2: memref<1x40xf32, #tpu.memory_space<vmem>>, %arg3: memref<40x256xf32, #tpu.memory_space<vmem>>, %arg4: memref<1x128xf32, #tpu.memory_space<vmem>>, %arg5: memref<2x8xf32, #tpu.memory_space<vmem>>, %arg6: memref<2x128xf32, #tpu.memory_space<vmem>>, %arg7: memref<2x128xf32, #tpu.memory_space<vmem>>) attributes {dimension_semantics = [#tpu.dimension_semantics<parallel>], iteration_bounds = array<i64: 1>, scalar_prefetch = 0 : i64, scratch_operands = 0 : i64, tpu.core_type = #tpu.core_type<tc>, window_params = [{pipeline_mode = #tpu.pipeline_mode<synchronous>, transform_indices = @transform_0, window_bounds = array<i64: 8, 168>}, {pipeline_mode = #tpu.pipeline_mode<synchronous>, transform_indices = @transform_1, window_bounds = array<i64: 1, 40>}, {pipeline_mode = #tpu.pipeline_mode<synchronous>, transform_indices = @transform_2, window_bounds = array<i64: 40, 256>}, {pipeline_mode = #tpu.pipeline_mode<synchronous>, transform_indices = @transform_3, window_bounds = array<i64: 1, 128>}, {transform_indices = @transform_4, window_bounds = array<i64: 2, 8>}, {transform_indices = @transform_5, window_bounds = array<i64: 2, 128>}, {transform_indices = @transform_6, window_bounds = array<i64: 2, 128>}]} {
    %c0 = arith.constant 0 : index
    %c0_0 = arith.constant 0 : index
    %0 = vector.load %arg5[%c0, %c0_0] : memref<2x8xf32, #tpu.memory_space<vmem>>, vector<2x8xf32>
    %c0_1 = arith.constant 0 : index
    %c0_2 = arith.constant 0 : index
    %1 = vector.load %arg1[%c0_1, %c0_2] : memref<8x168xf32, #tpu.memory_space<vmem>>, vector<8x168xf32>
    %cst = arith.constant dense<0.000000e+00> : vector<2x168xf32>
    %2 = tpu.matmul %0, %1, %cst {dimension_numbers = #tpu.dot_dimension_numbers<[1], [0], [0], [1], [0, 0, 1, 1], [], []>} : vector<2x8xf32>, vector<8x168xf32>, vector<2x168xf32> -> vector<2x168xf32>
    %3 = vector.extract_strided_slice %2 {offsets = [0, 0], sizes = [2, 128], strides = [1, 1]} : vector<2x168xf32> to vector<2x128xf32>
    %4 = vector.extract_strided_slice %2 {offsets = [0, 128], sizes = [2, 40], strides = [1, 1]} : vector<2x168xf32> to vector<2x40xf32>
    %c0_3 = arith.constant 0 : index
    %c0_4 = arith.constant 0 : index
    %5 = vector.load %arg2[%c0_3, %c0_4] : memref<1x40xf32, #tpu.memory_space<vmem>>, vector<1x40xf32>
    %6 = vector.broadcast %5 : vector<1x40xf32> to vector<2x40xf32>
    %7 = arith.subf %4, %6 : vector<2x40xf32>
    %8 = math.absf %7 : vector<2x40xf32>
    %cst_5 = arith.constant 5.000000e-01 : f32
    %9 = vector.broadcast %cst_5 : f32 to vector<2x40xf32>
    %10 = arith.cmpf olt, %8, %9 : vector<2x40xf32>
    %11 = arith.extui %10 : vector<2x40xi1> to vector<2x40xi32>
    %12 = arith.sitofp %11 : vector<2x40xi32> to vector<2x40xf32>
    %c0_6 = arith.constant 0 : index
    %c0_7 = arith.constant 0 : index
    %13 = vector.load %arg3[%c0_6, %c0_7] : memref<40x256xf32, #tpu.memory_space<vmem>>, vector<40x256xf32>
    %cst_8 = arith.constant dense<0.000000e+00> : vector<2x256xf32>
    %14 = tpu.matmul %12, %13, %cst_8 {dimension_numbers = #tpu.dot_dimension_numbers<[1], [0], [0], [1], [0, 0, 1, 1], [], []>} : vector<2x40xf32>, vector<40x256xf32>, vector<2x256xf32> -> vector<2x256xf32>
    %15 = vector.extract_strided_slice %14 {offsets = [0, 0], sizes = [2, 128], strides = [1, 1]} : vector<2x256xf32> to vector<2x128xf32>
    %16 = vector.extract_strided_slice %14 {offsets = [0, 128], sizes = [2, 128], strides = [1, 1]} : vector<2x256xf32> to vector<2x128xf32>
    %c0_9 = arith.constant 0 : index
    %c0_10 = arith.constant 0 : index
    %17 = vector.load %arg6[%c0_9, %c0_10] : memref<2x128xf32, #tpu.memory_space<vmem>>, vector<2x128xf32>
    %18 = arith.mulf %15, %3 : vector<2x128xf32>
    %19 = arith.addf %18, %16 : vector<2x128xf32>
    %20 = math.sin %19 : vector<2x128xf32>
    %c0_11 = arith.constant 0 : index
    %c0_12 = arith.constant 0 : index
    %21 = vector.load %arg4[%c0_11, %c0_12] : memref<1x128xf32, #tpu.memory_space<vmem>>, vector<1x128xf32>
    %22 = vector.shape_cast %21 : vector<1x128xf32> to vector<1x128xf32>
    %23 = vector.broadcast %22 : vector<1x128xf32> to vector<2x128xf32>
    %cst_13 = arith.constant 5.000000e-01 : f32
    %24 = vector.broadcast %cst_13 : f32 to vector<2x128xf32>
    %25 = arith.cmpf ogt, %23, %24 : vector<2x128xf32>
    %26 = arith.mulf %20, %17 : vector<2x128xf32>
    %27 = arith.select %25, %26, %17 : vector<2x128xi1>, vector<2x128xf32>
    %c0_14 = arith.constant 0 : index
    %c0_15 = arith.constant 0 : index
    %28 = vector.load %arg7[%c0_14, %c0_15] : memref<2x128xf32, #tpu.memory_space<vmem>>, vector<2x128xf32>
    tpu.vector_store %arg7[%c0_14, %c0_15], %27 {strides = array<i32>} : memref<2x128xf32, #tpu.memory_space<vmem>>, vector<2x128xf32>,
    return
  }
  func.func @transform_0(%arg0: i32) -> (i32, i32) {
    %c0_i32 = arith.constant 0 : i32
    %c0_i32_0 = arith.constant 0 : i32
    %c0_i32_1 = arith.constant 0 : i32
    return %c0_i32, %c0_i32_0 : i32, i32
  }
  func.func @transform_1(%arg0: i32) -> (i32, i32) {
    %c0_i32 = arith.constant 0 : i32
    %c0_i32_0 = arith.constant 0 : i32
    %c0_i32_1 = arith.constant 0 : i32
    return %c0_i32, %c0_i32_0 : i32, i32
  }
  func.func @transform_2(%arg0: i32) -> (i32, i32) {
    %c0_i32 = arith.constant 0 : i32
    %c0_i32_0 = arith.constant 0 : i32
    %c0_i32_1 = arith.constant 0 : i32
    return %c0_i32, %c0_i32_0 : i32, i32
  }
  func.func @transform_3(%arg0: i32) -> (i32, i32) {
    %c0_i32 = arith.constant 0 : i32
    %c0_i32_0 = arith.constant 0 : i32
    %c0_i32_1 = arith.constant 0 : i32
    return %c0_i32, %c0_i32_0 : i32, i32
  }
  func.func @transform_4(%arg0: i32) -> (i32, i32) {
    %c0_i32 = arith.constant 0 : i32
    %c0_i32_0 = arith.constant 0 : i32
    return %arg0, %c0_i32 : i32, i32
  }
  func.func @transform_5(%arg0: i32) -> (i32, i32) {
    %c0_i32 = arith.constant 0 : i32
    %c0_i32_0 = arith.constant 0 : i32
    return %arg0, %c0_i32 : i32, i32
  }
  func.func @transform_6(%arg0: i32) -> (i32, i32) {
    %c0_i32 = arith.constant 0 : i32
    %c0_i32_0 = arith.constant 0 : i32
    return %arg0, %c0_i32 : i32, i32
  }
}

</mosaic_0001>

<bundles_post_ra>
// kernel: tpu_custom_call.1
= control target key start
LH: loop header
LB: loop body
LE: loop exit
PB: predicated region body
PF: predicated region fallthrough
CT: control target
= control target key end

     0   :  { %11 = vsyncpa [#allocation3], 0  ;;  %s658_s0 = inlined_call_operand.hbm [shape: f32[8,168], index: 0, kind: input, shape index: {}]   ;;  %s659_s1 = inlined_call_operand.hbm [shape: f32[1,40], index: 1, kind: input, shape index: {}]   ;;  %s660_s2 = inlined_call_operand.hbm [shape: f32[40,256], index: 2, kind: input, shape index: {}]   ;;  %s661_s3 = inlined_call_operand.hbm [shape: f32[1,128], index: 3, kind: input, shape index: {}]   ;;  %s662_s4 = inlined_call_operand.vmem [shape: f32[2,8], index: 4, kind: input, shape index: {}]   ;;  %s663_s5 = inlined_call_operand.vmem [shape: f32[2,128], index: 5, kind: input, shape index: {}]   ;;  %s664_s6 = inlined_call_operand.hbm [shape: f32[2,128], index: 6, kind: output, shape index: {}]  }
   0x1   :  { %12 = vsyncpa [#allocation6], 0 }
   0x2   :  { %13 = vsyncpa [#allocation9], 0  ;;  %s31_s23 = sshll.u32 %s659_s1, 4  ;;  %s32_s23 = int_to_ptr.hbm [resolvable:$true] %s31_s23 }
   0x3   :  { %14 = vsyncpa [#allocation4], 0  ;;  %s529_s24 = smov [#allocation5]   ;;  %s20_s28 = sshll.u32 %s658_s0, 4  ;;  %s21_s28 = int_to_ptr.hbm [resolvable:$true] %s20_s28 }
   0x4   :  { %s33_s25 = sshll.u32 %s529_s24, 4  ;;  %s530_s29 = smov [#allocation2]   ;;  %s34_s25 = int_to_ptr.vmem [resolvable:$true] %s33_s25 }
   0x5   :  { %36 = dma.hbm_to_vmem [thread:$0]  %s32_s23, 16, %s34_s25, [#allocation6]  }
   0x6   :  { %s22_s30 = sshll.u32 %s530_s29, 4  ;;  %s41_s9 = sshll.u32 %s660_s2, 4  ;;  %s23_s30 = int_to_ptr.vmem [resolvable:$true] %s22_s30  ;;  %s42_s9 = int_to_ptr.hbm [resolvable:$true] %s41_s9 }
   0x7   :  { %25 = dma.hbm_to_vmem [thread:$0]  %s21_s28, 256, %s23_s30, [#allocation3]  }
   0x8   :  { %s531_s1 = smov [#allocation7]   ;;  %s55_s13 = sshll.u32 %s661_s3, 4  ;;  %s56_s13 = int_to_ptr.hbm [resolvable:$true] %s55_s13 }
   0x9   :  { %s43_s10 = sshll.u32 %s531_s1, 4  ;;  %s532_s14 = smov 256   ;;  %s44_s10 = int_to_ptr.vmem [resolvable:$true] %s43_s10 }
   0xa   :  { %s533_s0 = smov 16   ;;  %s534_s15 = smov [#allocation8]  }
   0xb   :  { %49 = dma.hbm_to_vmem [thread:$0]  %s42_s9, 1280, %s44_s10, [#allocation6], %s532_s14, %s532_s14, %s533_s0  }
   0xc   :  { %s57_s16 = sshll.u32 %s534_s15, 4  ;;  %s58_s16 = int_to_ptr.vmem [resolvable:$true] %s57_s16 }
   0xd   :  { %60 = dma.hbm_to_vmem [thread:$0]  %s56_s13, 16, %s58_s16, [#allocation9]  }
   0xe   :  { %521 = dma.done.wait [#allocation3], 256  }
   0xf   :  { %522 = vsyncadd [#allocation3], 4294967040 }
  0x10   :  { %523 = dma.done.wait [#allocation6], 1296  }
  0x11   :  { %524 = vsyncadd [#allocation6], 4294966000 }
  0x12   :  { %525 = dma.done.wait [#allocation9], 16  }
  0x13   :  { %526 = vsyncadd [#allocation9], 4294967280  ;;  %vm84_vm0 = vcmask 64512   ;;  %v83_v0 = vld [vmem:[#allocation2 + $0x8] sm:$0xff]  ;;  %v81_v1 = vld [vmem:[%s662_s4] sm:$0x3] }
  0x14   :  { %v145_v2 = vld [vmem:[#allocation7 + $0x40] sm:$0xff]  ;;  %123 = vmatpush.msra.mxu1 %v83_v0  ;;  %v146_v3 = vld [vmem:[#allocation7 + $0x48] sm:$0xff]  ;;  %v143_v4 = vld [vmem:[#allocation7 + $0x30] sm:$0xff]  ;;  %vm147_vm1 = vcmask 326656   ;;  %v535_v17 = vmov 0.0   ;;  %s543_s18 = smov [#allocation10]  }
  0x15   :  { %162 = vmatpush.msra.mxu2 %v145_v2  ;;  %377 = vmatmul.msk.f32.vlgmr.msra.gmra.mxu1 %vm84_vm0, %v81_v1  ;;  %v144_v5 = vld [vmem:[#allocation7 + $0x38] sm:$0xff]  ;;  %v141_v6 = vld [vmem:[#allocation7 + $0x20] sm:$0xff]  ;;  %v142_v7 = vld [vmem:[#allocation7 + $0x28] sm:$0xff]  ;;  %v536_v35 = vmov 683565275   ;;  %s362_s19 = sshll.u32 %s543_s18, 4  ;;  %s363_s19 = int_to_ptr.vmem [resolvable:$true] %s362_s19 }
  0x16   :  { %182 = vmatpush.msra.mxu3 %v146_v3  ;;  %v139_v8 = vld [vmem:[#allocation7 + $0x10] sm:$0xff]  ;;  %v140_v9 = vld [vmem:[#allocation7 + $0x18] sm:$0xff]  ;;  %v137_v10 = vld [vmem:[#allocation7] sm:$0xff]  ;;  %v537_v37 = vmov 2475754826   ;;  %s364_s22 = sshll.u32 %s664_s6, 4  ;;  %s365_s22 = int_to_ptr.hbm [resolvable:$true] %s364_s22 }
  0x17   :  { %163 = vmatpush.msra.mxu2 %v143_v4  ;;  %v138_v11 = vld [vmem:[#allocation7 + $0x8] sm:$0xff]  ;;  %v399_v13 = vld [vmem:[#allocation5] ss:$0 sm:$0xff]  ;;  %v538_v40 = vmov 2131351028  }
  0x18   :  { %183 = vmatpush.msra.mxu3 %v144_v5  ;;  %v82_v12 = vld [vmem:[#allocation2] sm:$0xff]  ;;  %v539_v43 = vmov 2102212464   ;;  %v540_v46 = vmov 920167782  }
  0x19   :  { %164 = vmatpush.msra.mxu2 %v141_v6  ;;  %103 = vmatpush.msra.mxu0 %v82_v12  ;;  %v541_v49 = vmov 1326507024  }
  0x1a   :  { %184 = vmatpush.msra.mxu3 %v142_v7  ;;  %376 = vmatmul.msk.f32.vlgmr.msra.gmra.mxu0 %vm84_vm0, %v81_v1 }
  0x1b   :  { %165 = vmatpush.msra.mxu2 %v139_v8 }
  0x1c   :  { %185 = vmatpush.msra.mxu3 %v140_v9 }
  0x1d   :  { %166 = vmatpush.msra.mxu2 %v137_v10 }
  0x1e   :  { %186 = vmatpush.msra.mxu3 %v138_v11 }
  0x92   :  { %v125_v14 = vpop.f32.mrf.mxu1 }
  0x93   :  { %v132_v15 = vsub.f32 %v125_v14, %v399_v13 }
  0x95   :  { %v133_v16 = vand.u32 2147483647, %v132_v15 }
  0x97   :  { %vm134_vm2 = vcmp.lt.f32.partialorder %v133_v16, 0.5  ;;  %v105_v19 = vpop.f32.mrf.mxu0 }
  0x98   :  { %v378_v18 = vsel %vm134_vm2, 1.0, %v535_v17 }
  0x99   :  { %379 = vmatmul.msk.f32.vlgmr.msra.gmra.mxu2 %vm147_vm1, %v378_v18  ;;  %380 = vmatmul.msk.f32.vlgmr.msra.gmra.mxu3 %vm147_vm1, %v378_v18 }
 0x11c   :  { %v168_v20 = vpop.f32.mrf.mxu2  ;;  %v188_v22 = vpop.f32.mrf.mxu3 }
 0x11d   :  { %v192_v21 = vmul.f32 %v168_v20, %v105_v19  ;;  %v542_v19 = vmov 0  }
 0x11f   :  { %v596_v23 = vadd.f32 %v192_v21, %v188_v22 }
 0x121   :  { %v197_v24 = vand.u32 2139095040, %v596_v23  ;;  %v194_v27 = vand.u32 2147483647, %v596_v23  ;;  %vm196_vm15 = vcmp.lt.s32.totalorder %v596_v23, 0 }
 0x123   :  { %v198_v25 = vshrl.u32 %v197_v24, 23  ;;  %v201_v29 = vand.u32 8388607, %v194_v27  ;;  %vm195_vm0 = vcmp.le.f32.partialorder %v194_v27, 0.7853982 }
 0x125   :  { %v381_v26 = vadd.s32 4294967169, %v198_v25  ;;  %v202_v33 = vor.u32 8388608, %v201_v29 }
 0x127   :  { %v204_v28 = vadd.s32 1, %v381_v26  ;;  %v613_v56 = vshll.u32 %v202_v33, 8 }
 0x129   :  { %vm205_vm3 = vcmp.gt.s32.totalorder %v204_v28, 0  ;;  %v243_v1 = vand.u32 65535, %v613_v56  ;;  %v244_v2 = vshrl.u32 %v613_v56, 16 }
 0x12a   :  { %v206_v30 = vsel %vm205_vm3, %v204_v28, 0 }
 0x12b   :  { %v208_v31 = vand.u32 31, %v206_v30  ;;  %v604_v34 = vshrl.u32 %v206_v30, 5 }
 0x12d   :  { %v602_v32 = vsub.s32 32, %v208_v31  ;;  %v211_v36 = vshll.u32 %v536_v35, %v208_v31  ;;  %v214_v38 = vshll.u32 %v537_v37, %v208_v31  ;;  %v217_v42 = vshll.u32 %v538_v40, %v208_v31 }
 0x12e   :  { %v220_v45 = vshll.u32 %v539_v43, %v208_v31  ;;  %v223_v48 = vshll.u32 %v540_v46, %v208_v31  ;;  %vm226_vm4 = vcmp.lt.s32.totalorder %v604_v34, 1  ;;  %vm229_vm5 = vcmp.lt.s32.totalorder %v604_v34, 4 }
 0x12f   :  { %v212_v39 = vshrl.u32 %v537_v37, %v602_v32  ;;  %v215_v41 = vshrl.u32 %v538_v40, %v602_v32  ;;  %v218_v44 = vshrl.u32 %v539_v43, %v602_v32  ;;  %v221_v47 = vshrl.u32 %v540_v46, %v602_v32 }
 0x130   :  { %v224_v50 = vshrl.u32 %v541_v49, %v602_v32  ;;  %vm228_vm6 = vcmp.lt.s32.totalorder %v604_v34, 3  ;;  %vm227_vm7 = vcmp.lt.s32.totalorder %v604_v34, 2  ;;  %v210_v30 = vshrl.u32 %v536_v35, %v602_v32 }
 0x131   :  { %v213_v51 = vor.u32 %v212_v39, %v211_v36  ;;  %v216_v52 = vor.u32 %v215_v41, %v214_v38  ;;  %v219_v53 = vor.u32 %v218_v44, %v217_v42  ;;  %v222_v54 = vor.u32 %v221_v47, %v220_v45 }
 0x132   :  { %v225_v55 = vor.u32 %v224_v50, %v223_v48 }
 0x133   :  { %v234_v57 = vsel %vm226_vm4, %v213_v51, %v216_v52  ;;  %v238_v58 = vsel %vm226_vm4, %v216_v52, %v219_v53  ;;  %v235_v59 = vsel %vm229_vm5, %v222_v54, 920167782  ;;  %v231_v26 = vsel %vm229_vm5, %v219_v53, 2102212464 }
 0x134   :  { %v239_v60 = vsel %vm229_vm5, %v225_v55, 1326507024  ;;  %v236_v61 = vsel %vm228_vm6, %v219_v53, %v235_v59  ;;  %v230_v39 = vsel %vm226_vm4, %v210_v30, %v213_v51  ;;  %v232_v40 = vsel %vm228_vm6, %v216_v52, %v231_v26 }
 0x135   :  { %v240_v62 = vsel %vm228_vm6, %v222_v54, %v239_v60  ;;  %v237_v63 = vsel %vm227_vm7, %v234_v57, %v236_v61  ;;  %v233_v32 = vsel %vm227_vm7, %v230_v39, %v232_v40  ;;  %vm337_vm4 = vweird.f32 %v596_v23 }
 0x136   :  { %v241_v0 = vsel %vm227_vm7, %v238_v58, %v240_v62  ;;  %v267_v5 = vand.u32 65535, %v237_v63  ;;  %v268_v6 = vshrl.u32 %v237_v63, 16  ;;  %v287_v48 = vmul.u32 %v613_v56, %v233_v32 }
 0x137   :  { %v245_v3 = vand.u32 65535, %v241_v0  ;;  %v246_v4 = vshrl.u32 %v241_v0, 16 }
 0x138   :  { %v270_v9 = vmul.u32 %v268_v6, %v243_v1  ;;  %v271_v10 = vmul.u32 %v267_v5, %v244_v2  ;;  %v269_v14 = vmul.u32 %v267_v5, %v243_v1  ;;  %v272_v18 = vmul.u32 %v268_v6, %v244_v2 }
 0x139   :  { %v248_v7 = vmul.u32 %v246_v4, %v243_v1  ;;  %v249_v8 = vmul.u32 %v245_v3, %v244_v2  ;;  %v247_v11 = vmul.u32 %v245_v3, %v243_v1  ;;  %v250_v13 = vmul.u32 %v246_v4, %v244_v2 }
 0x13a   :  { %v273_v15 = vshll.u32 %v270_v9, 16  ;;  %v275_v21 = vshll.u32 %v271_v10, 16  ;;  %v274_v37 = vshrl.u32 %v270_v9, 16  ;;  %v276_v43 = vshrl.u32 %v271_v10, 16 }
 0x13b   :  { %v251_v12 = vshll.u32 %v248_v7, 16  ;;  %v253_v16 = vshll.u32 %v249_v8, 16  ;;  %v252_v31 = vshrl.u32 %v248_v7, 16  ;;  %v254_v41 = vshrl.u32 %v249_v8, 16 }
 0x13c   :  { %vm277_vm9 = vc.u32 %v269_v14, %v273_v15  ;;  %v279_v22 = vadd.s32 %v273_v15, %v269_v14 }
 0x13d   :  { %vm255_vm8 = vc.u32 %v247_v11, %v251_v12  ;;  %v257_v17 = vadd.s32 %v251_v12, %v247_v11  ;;  %v278_v25 = vsel %vm277_vm9, 1, %v542_v19 }
 0x13e   :  { %v256_v20 = vsel %vm255_vm8, 1, %v542_v19  ;;  %v280_v29 = vadd.s32 %v278_v25, %v272_v18  ;;  %vm281_vm11 = vc.u32 %v279_v22, %v275_v21  ;;  %v283_v46 = vadd.s32 %v279_v22, %v275_v21 }
 0x13f   :  { %v258_v24 = vadd.s32 %v256_v20, %v250_v13  ;;  %vm259_vm10 = vc.u32 %v257_v17, %v253_v16  ;;  %v282_v36 = vsel %vm281_vm11, 1, %v542_v19 }
 0x140   :  { %v260_v28 = vsel %vm259_vm10, 1, %v542_v19  ;;  %v284_v38 = vadd.s32 %v282_v36, %v280_v29  ;;  %v191_v36 = vld [vmem:[%s663_s5] sm:$0x3] }
 0x141   :  { %v262_v33 = vadd.s32 %v260_v28, %v258_v24 }
 0x142   :  { %v285_v44 = vadd.s32 %v284_v38, %v274_v37 }
 0x143   :  { %v263_v42 = vadd.s32 %v262_v33, %v252_v31  ;;  %v400_v33 = vld [vmem:[#allocation8] ss:$0 sm:$0xff] }
 0x144   :  { %v286_v35 = vadd.s32 %v285_v44, %v276_v43  ;;  %vm353_vm5 = vcmp.gt.f32.partialorder %v400_v33, 0.5 }
 0x145   :  { %v264_v45 = vadd.s32 %v263_v42, %v254_v41 }
 0x146   :  { %v290_v47 = vadd.s32 1, %v286_v35 }
 0x147   :  { %vm289_vm12 = vc.u32 %v264_v45, %v283_v46  ;;  %v288_v34 = vadd.s32 %v283_v46, %v264_v45 }
 0x148   :  { %v291_v49 = vsel %vm289_vm12, %v290_v47, %v286_v35 }
 0x149   :  { %v292_v50 = vadd.s32 %v291_v49, %v287_v48 }
 0x14b   :  { %v293_v51 = vadd.s32 536870912, %v292_v50 }
 0x14d   :  { %v294_v53 = vshrl.u32 %v293_v51, 30 }
 0x14f   :  { %v295_v54 = vshll.u32 %v294_v53, 30  ;;  %v318_v9 = vsub.s32 4, %v294_v53 }
 0x151   :  { %v296_v52 = vsub.s32 %v292_v50, %v295_v54  ;;  %v319_v14 = vsel %vm196_vm15, %v318_v9, %v294_v53 }
 0x152   :  { %v321_v17 = vsel %vm195_vm0, 0, %v319_v14 }
 0x153   :  { %vm297_vm13 = vcmp.lt.s32.totalorder %v296_v52, 0  ;;  %v298_v55 = vsub.s32 0, %v296_v52  ;;  %v338_v22 = vadd.s32 3, %v321_v17 }
 0x155   :  { %v299_v57 = vsel %vm297_vm13, %v298_v55, %v296_v52  ;;  %v339_v28 = vand.u32 3, %v338_v22 }
 0x156   :  { %v300_v58 = vclz %v299_v57 }
 0x157   :  { %vm341_vm1 = vcmp.eq.s32.totalorder %v339_v28, 0  ;;  %vm344_vm2 = vcmp.eq.s32.totalorder %v339_v28, 2  ;;  %vm340_vm3 = vcmp.lt.s32.totalorder %v339_v28, 2 }
 0x158   :  { %v382_v59 = vadd.s32 4294967294, %v300_v58 }
 0x15a   :  { %vm383_vm14 = vcmp.lt.s32.totalorder %v382_v59, 0 }
 0x15b   :  { %v303_v60 = vsel %vm383_vm14, 0, %v382_v59 }
 0x15c   :  { %v304_v61 = vsub.s32 32, %v303_v60  ;;  %v308_v62 = vsub.s32 4294967266, %v303_v60  ;;  %v305_v63 = vshll.u32 %v296_v52, %v303_v60 }
 0x15e   :  { %v306_v0 = vshrl.u32 %v288_v34, %v304_v61  ;;  %v309_v1 = vadd.s32 127, %v308_v62 }
 0x160   :  { %v307_v56 = vor.u32 %v306_v0, %v305_v63  ;;  %v310_v2 = vshll.u32 %v309_v1, 23 }
 0x162   :  { %v311_v3 = vor.u32 4788187, %v310_v2  ;;  %v314_v5 = vcvt.s32.f32 %v307_v56 }
 0x164   :  { %v312_v4 = vand.u32 2147483647, %v311_v3 }
 0x166   :  { %v315_v6 = vmul.f32 %v314_v5, %v312_v4 }
 0x168   :  { %v316_v7 = vxor.u32 2147483648, %v315_v6 }
 0x16a   :  { %v317_v8 = vsel %vm196_vm15, %v316_v7, %v315_v6 }
 0x16b   :  { %v320_v10 = vsel %vm195_vm0, %v596_v23, %v317_v8 }
 0x16c   :  { %v322_v11 = vmul.f32 %v320_v10, %v320_v10 }
 0x16e   :  { %v330_v12 = vmul.f32 -0.00019511016, %v322_v11  ;;  %v323_v13 = vmul.f32 -0.001358992, %v322_v11 }
 0x170   :  { %v331_v15 = vadd.f32 0.008332121, %v330_v12  ;;  %v324_v16 = vadd.f32 0.041655596, %v323_v13 }
 0x172   :  { %v332_v18 = vmul.f32 %v331_v15, %v322_v11  ;;  %v325_v19 = vmul.f32 %v324_v16, %v322_v11 }
 0x174   :  { %v333_v20 = vadd.f32 -0.16666654, %v332_v18  ;;  %v326_v21 = vadd.f32 -0.4999988, %v325_v19 }
 0x176   :  { %v334_v24 = vmul.f32 %v333_v20, %v322_v11  ;;  %v327_v25 = vmul.f32 %v326_v21, %v322_v11 }
 0x178   :  { %v335_v26 = vadd.f32 1.0, %v334_v24  ;;  %v328_v27 = vadd.f32 1.0, %v327_v25 }
 0x17a   :  { %v336_v29 = vmul.f32 %v335_v26, %v320_v10  ;;  %v345_v30 = vxor.u32 2147483648, %v328_v27 }
 0x17c   :  { %v342_v31 = vxor.u32 2147483648, %v336_v29  ;;  %v346_v38 = vsel %vm344_vm2, %v345_v30, %v336_v29 }
 0x17e   :  { %v343_v37 = vsel %vm341_vm1, %v328_v27, %v342_v31 }
 0x17f   :  { %v347_v39 = vsel %vm340_vm3, %v343_v37, %v346_v38 }
 0x180   :  { %v348_v40 = vsel %vm337_vm4, nan, %v347_v39 }
 0x181   :  { %v354_v41 = vmul.f32 %v348_v40, %v191_v36 }
 0x183   :  { %v355_v42 = vsel %vm353_vm5, %v354_v41, %v191_v36 }
 0x184   :  { %356 = vst [vmem:[#allocation10] sm:$0x3] %v355_v42 }
 0x185   :  { %367 = dma.vmem_to_hbm [thread:$0]  %s363_s19, 32, %s365_s22, [#allocation4]  }
 0x186   :  { %527 = dma.done.wait [#allocation4], 32  }
 0x187   :  { %528 = vsyncadd [#allocation4], 4294967264 }
 0x188   :  { %372 = vsyncpa [#allocation3], 1 }
 0x189   :  { %373 = vsyncpa [#allocation6], 1 }
 0x18a   :  { %374 = vsyncpa [#allocation9], 1 }
 0x18b   :  { %375 = vsyncpa [#allocation4], 1 }

</bundles_post_ra>
